<compile_context>
chip_gen: v7x
topology: tpu7x:2x2x1
jax: 0.10.0
libtpu: 0.0.40
codegen_flags: <defaults>
</compile_context>

<pallas_src>
import jax
import jax.numpy as jnp
import numpy as np
from jax.experimental import pallas as pl
from jax.experimental.pallas import tpu as pltpu

_VMEM_LIMIT = 32 * 1024 * 1024   # safe on v5e/v6e (128 MiB) and v7x (64 MiB)


# ----------------------------------------------------------------------------
# Pallas kernels
# ----------------------------------------------------------------------------
def _make_gemm_kernel(relu_in, relu_out):
    """out = act_out( act_in(x) @ w + b ) — one fat MXU GEMM per M-tile."""

    def kernel(x_ref, w_ref, b_ref, o_ref):
        x = x_ref[...]                               # (tile_m, K*K*Cin) bf16
        if relu_in:
            x = jnp.maximum(x, 0)
        acc = jnp.dot(x, w_ref[...], preferred_element_type=jnp.float32)
        acc = acc + b_ref[...]                       # (1, Nout) f32 broadcast
        if relu_out:
            acc = jnp.maximum(acc, 0.0)
        o_ref[...] = acc.astype(o_ref.dtype)

    return kernel


def _residual_kernel(xcol_ref, w3_ref, w1_ref, xres_ref, o_ref):
    """Fused residual block: out = x + relu(conv3x3(relu(x))) @ W1.

    The intermediate h stays in VMEM/vregs (never round-trips HBM).  Applying
    ReLU to the im2col slab equals ReLU before the conv since relu(0) == 0 on
    the zero padding.
    """
    xc = jnp.maximum(xcol_ref[...], 0)                       # relu_in
    h = jnp.dot(xc, w3_ref[...], preferred_element_type=jnp.float32)
    h = jnp.maximum(h, 0.0).astype(w1_ref.dtype)             # relu, back to bf16
    y = jnp.dot(h, w1_ref[...], preferred_element_type=jnp.float32)
    o_ref[...] = (xres_ref[...] + y).astype(o_ref.dtype)     # residual add


# ----------------------------------------------------------------------------
# Pallas wrappers (M-tiled GEMMs, "parallel" grid axis for v7x's 2 TCs)
# ----------------------------------------------------------------------------
def _pad_rows(a, mult):
    m = a.shape[0]
    mp = pl.cdiv(m, mult) * mult
    if mp != m:
        a = jnp.pad(a, ((0, mp - m),) + ((0, 0),) * (a.ndim - 1))
    return a


def gemm_pallas(xcol, w, bias, *, relu_in=False, relu_out=False,
                tile_m=256, compute_dtype=jnp.bfloat16):
    """xcol: (M, Kd), w: (Kd, Nout), bias: (Nout,) -> (M, Nout) f32."""
    m, kd = xcol.shape
    nout = w.shape[1]
    xp = _pad_rows(xcol.astype(compute_dtype), tile_m)
    mp = xp.shape[0]
    w = w.astype(compute_dtype)
    b2 = bias.reshape(1, nout).astype(jnp.float32)

    out = pl.pallas_call(
        _make_gemm_kernel(relu_in, relu_out),
        out_shape=jax.ShapeDtypeStruct((mp, nout), jnp.float32),
        grid=(mp // tile_m,),
        in_specs=[
            pl.BlockSpec((tile_m, kd), lambda i: (i, 0)),
            pl.BlockSpec((kd, nout), lambda i: (0, 0)),
            pl.BlockSpec((1, nout), lambda i: (0, 0)),
        ],
        out_specs=pl.BlockSpec((tile_m, nout), lambda i: (i, 0)),
        compiler_params=pltpu.CompilerParams(
            dimension_semantics=("parallel",),
            vmem_limit_bytes=_VMEM_LIMIT),
    )(xp, w, b2)
    return out[:m]


def residual_block_pallas(x, w3_oihw, w1_oihw, *, tile_m=256,
                          compute_dtype=jnp.bfloat16):
    """x: (N,H,W,C) f32 -> x + conv1x1(relu(conv3x3(relu(x)))), fully fused."""
    n, h, w, c = x.shape
    cr = w3_oihw.shape[0]
    xcol = im2col_nhwc(x.astype(compute_dtype), 3, 1)        # (M, 9C) bf16
    w3 = conv_oihw_to_gemm(w3_oihw).astype(compute_dtype)    # (9C, Cr)
    w1 = w1_oihw[:, :, 0, 0].T.astype(compute_dtype)         # (Cr, C)
    xres = x.reshape(n * h * w, c)                           # f32 residual
    m = n * h * w
    xcol_p = _pad_rows(xcol, tile_m)
    xres_p = _pad_rows(xres, tile_m)
    mp = xcol_p.shape[0]

    out = pl.pallas_call(
        _residual_kernel,
        out_shape=jax.ShapeDtypeStruct((mp, c), jnp.float32),
        grid=(mp // tile_m,),
        in_specs=[
            pl.BlockSpec((tile_m, 9 * c), lambda i: (i, 0)),
            pl.BlockSpec((9 * c, cr), lambda i: (0, 0)),
            pl.BlockSpec((cr, c), lambda i: (0, 0)),
            pl.BlockSpec((tile_m, c), lambda i: (i, 0)),
        ],
        out_specs=pl.BlockSpec((tile_m, c), lambda i: (i, 0)),
        compiler_params=pltpu.CompilerParams(
            dimension_semantics=("parallel",),
            vmem_limit_bytes=_VMEM_LIMIT),
    )(xcol_p, w3, w1, xres_p)
    return out[:m].reshape(n, h, w, c)


# ----------------------------------------------------------------------------
# Layout glue (im2col, weight repacking, depth-to-space) — plain JAX/XLA
# ----------------------------------------------------------------------------
def im2col_nhwc(x, k, pad):
    """(N,H,W,C) -> (N*Ho*Wo, k*k*C) with tap order (dy, dx, c)."""
    n, h, w, c = x.shape
    xp = jnp.pad(x, ((0, 0), (pad, pad), (pad, pad), (0, 0)))
    ho = h + 2 * pad - k + 1
    wo = w + 2 * pad - k + 1
    cols = [xp[:, dy:dy + ho, dx:dx + wo, :]
            for dy in range(k) for dx in range(k)]
    return jnp.concatenate(cols, axis=-1).reshape(n * ho * wo, k * k * c)


def conv_oihw_to_gemm(w):
    """PyTorch Conv2d weight (O,I,kh,kw) -> (kh*kw*I, O), matching im2col order."""
    o, i, kh, kw = w.shape
    return jnp.transpose(w, (2, 3, 1, 0)).reshape(kh * kw * i, o)


def convt_to_gemm(wt):
    """ConvTranspose2d(k=4,s=2,p=1) weight (Cin,Cout,4,4) -> (9*Cin, 4*Cout).

    Sub-pixel decomposition: output pixel (2i+py, 2j+px) only depends on the
    3x3 input neighbourhood of (i, j); its kernel tap is (3-2*dy+py, 3-2*dx+px)
    (zero where out of range).  One 3x3/pad-1 GEMM then produces all four
    parities at once; depth_to_space2 interleaves them.
    """
    cin, cout = wt.shape[:2]
    w3 = jnp.zeros((3, 3, cin, 2, 2, cout), wt.dtype)
    for dy in range(3):
        for py in range(2):
            kh = 3 - 2 * dy + py
            if not 0 <= kh < 4:
                continue
            for dx in range(3):
                for px in range(2):
                    kw = 3 - 2 * dx + px
                    if not 0 <= kw < 4:
                        continue
                    w3 = w3.at[dy, dx, :, py, px, :].set(wt[:, :, kh, kw])
    return w3.reshape(9 * cin, 4 * cout)


def depth_to_space2(y4, n, h, w, c):
    """(N*H*W, 4*C) with channel order (py, px, c) -> (N, 2H, 2W, C)."""
    y = y4.reshape(n, h, w, 2, 2, c)
    y = jnp.transpose(y, (0, 1, 3, 2, 4, 5))
    return y.reshape(n, 2 * h, 2 * w, c)


# ----------------------------------------------------------------------------
# Decoder forward (Pallas path)
# ----------------------------------------------------------------------------
def decoder_pallas(x_nchw, p, *, tile_m=256, compute_dtype=jnp.bfloat16):
    x = jnp.transpose(x_nchw, (0, 2, 3, 1)).astype(jnp.float32)   # NCHW -> NHWC
    n, h, w, _ = x.shape
    ch = p["w1"].shape[0]

    # conv_1: 3x3, pad 1, with bias.
    y = gemm_pallas(im2col_nhwc(x.astype(compute_dtype), 3, 1),
                    conv_oihw_to_gemm(p["w1"]), p["b1"],
                    tile_m=tile_m, compute_dtype=compute_dtype)
    x = y.reshape(n, h, w, ch)

    # Residual stack: each layer is a single fused pallas_call.
    for wr3, wr1 in p["res"]:
        x = residual_block_pallas(x, wr3, wr1, tile_m=tile_m,
                                  compute_dtype=compute_dtype)

    # conv_trans_1 (k=4,s=2,p=1): trailing stack-ReLU fused as relu_in
    # (relu(0)==0 so applying it on the im2col slab is equivalent), and the
    # post-transposed-conv ReLU fused as relu_out.
    c1 = p["wt1"].shape[1]
    y4 = gemm_pallas(im2col_nhwc(x.astype(compute_dtype), 3, 1),
                     convt_to_gemm(p["wt1"]), jnp.tile(p["bt1"], 4),
                     relu_in=True, relu_out=True,
                     tile_m=tile_m, compute_dtype=compute_dtype)
    x = depth_to_space2(y4, n, h, w, c1)
    h, w = 2 * h, 2 * w

    # conv_trans_2 (k=4,s=2,p=1).
    c2 = p["wt2"].shape[1]
    y4 = gemm_pallas(im2col_nhwc(x.astype(compute_dtype), 3, 1),
                     convt_to_gemm(p["wt2"]), jnp.tile(p["bt2"], 4),
                     tile_m=tile_m, compute_dtype=compute_dtype)
    x = depth_to_space2(y4, n, h, w, c2)
    return jnp.transpose(x, (0, 3, 1, 2))                      # NHWC -> NCHW


# ----------------------------------------------------------------------------
# Pure-JAX reference (lax convolutions) for correctness checking
# ----------------------------------------------------------------------------
def decoder_ref(x_nchw, p):
    dn = ("NHWC", "HWIO", "NHWC")

    def conv(x, w_oihw, pad):
        w = jnp.transpose(w_oihw, (2, 3, 1, 0))
        return jax.lax.conv_general_dilated(x, w, (1, 1), [(pad, pad)] * 2,
                                            dimension_numbers=dn)

    def convT(x, w_iokk, b):
        wf = jnp.transpose(w_iokk[:, :, ::-1, ::-1], (2, 3, 0, 1))
        y = jax.lax.conv_general_dilated(x, wf, (1, 1), [(2, 2)] * 2,
                                         lhs_dilation=(2, 2),
                                         dimension_numbers=dn)
        return y + b

    x = jnp.transpose(x_nchw, (0, 2, 3, 1))
    x = conv(x, p["w1"], 1) + p["b1"]
    for wr3, wr1 in p["res"]:
        h = jax.nn.relu(conv(jax.nn.relu(x), wr3, 1))
        x = x + conv(h, wr1, 0)
    x = jax.nn.relu(x)
    x = jax.nn.relu(convT(x, p["wt1"], p["bt1"]))
    x = convT(x, p["wt2"], p["bt2"])
    return jnp.transpose(x, (0, 3, 1, 2))


# ----------------------------------------------------------------------------
if __name__ == "__main__":
    key = jax.random.PRNGKey(0)
    B, Cin, H, W = 2, 4, 16, 16
    Ch, Cr, n_res = 64, 32, 2       # num_hiddens, num_residual_hiddens, layers
    scale = 0.05

    ki = iter(jax.random.split(key, 7 + 2 * n_res))
    params = {
        "w1": scale * jax.random.normal(next(ki), (Ch, Cin, 3, 3), jnp.float32),
        "b1": scale * jax.random.normal(next(ki), (Ch,), jnp.float32),
        "res": [
            (scale * jax.random.normal(next(ki), (Cr, Ch, 3, 3), jnp.float32),
             scale * jax.random.normal(next(ki), (Ch, Cr, 1, 1), jnp.float32))
            for _ in range(n_res)
        ],
        "wt1": scale * jax.random.normal(next(ki), (Ch, Ch // 2, 4, 4), jnp.float32),
        "bt1": scale * jax.random.normal(next(ki), (Ch // 2,), jnp.float32),
        "wt2": scale * jax.random.normal(next(ki), (Ch // 2, 3, 4, 4), jnp.float32),
        "bt2": scale * jax.random.normal(next(ki), (3,), jnp.float32),
    }
    x = jax.random.normal(next(ki), (B, Cin, H, W), jnp.float32)

    ref = jax.block_until_ready(decoder_ref(x, params))

    # Strict correctness gate: f32 compute path.
    out_f32 = jax.block_until_ready(
        decoder_pallas(x, params, compute_dtype=jnp.float32))
    assert out_f32.shape == (B, 3, 4 * H, 4 * W), out_f32.shape
    np.testing.assert_allclose(np.asarray(out_f32), np.asarray(ref),
                               rtol=1e-3, atol=1e-4)

    # Production path: bf16 MXU operands with f32 accumulation
    # (bf16-appropriate tolerances vs. the f32 reference).
    out_bf16 = jax.block_until_ready(
        decoder_pallas(x, params, compute_dtype=jnp.bfloat16))
    assert out_bf16.shape == (B, 3, 4 * H, 4 * W), out_bf16.shape
    np.testing.assert_allclose(np.asarray(out_bf16), np.asarray(ref),
                               rtol=5e-2, atol=2e-2)

    print("KERNEL_OK")
</pallas_src>

<mosaic_0001>
module attributes {stable_mosaic.version = 11 : i64} {
  func.func @kernel(%arg0: i32, %arg1: memref<256x36xf32, #tpu.memory_space<vmem>>, %arg2: memref<36x64xf32, #tpu.memory_space<vmem>>, %arg3: memref<1x64xf32, #tpu.memory_space<vmem>>, %arg4: memref<256x64xf32, #tpu.memory_space<vmem>>) attributes {dimension_semantics = [#tpu.dimension_semantics<parallel>], iteration_bounds = array<i64: 2>, scalar_prefetch = 0 : i64, scratch_operands = 0 : i64, tpu.core_type = #tpu.core_type<tc>, window_params = [{transform_indices = @transform_0, window_bounds = array<i64: 256, 36>}, {pipeline_mode = #tpu.pipeline_mode<synchronous>, transform_indices = @transform_1, window_bounds = array<i64: 36, 64>}, {pipeline_mode = #tpu.pipeline_mode<synchronous>, transform_indices = @transform_2, window_bounds = array<i64: 1, 64>}, {transform_indices = @transform_3, window_bounds = array<i64: 256, 64>}]} {
    %c0 = arith.constant 0 : index
    %c0_0 = arith.constant 0 : index
    %0 = vector.load %arg1[%c0, %c0_0] : memref<256x36xf32, #tpu.memory_space<vmem>>, vector<256x36xf32>
    %c0_1 = arith.constant 0 : index
    %c0_2 = arith.constant 0 : index
    %1 = vector.load %arg2[%c0_1, %c0_2] : memref<36x64xf32, #tpu.memory_space<vmem>>, vector<36x64xf32>
    %cst = arith.constant dense<0.000000e+00> : vector<256x64xf32>
    %2 = tpu.matmul %0, %1, %cst {dimension_numbers = #tpu.dot_dimension_numbers<[1], [0], [0], [1], [0, 0, 1, 1], [], []>} : vector<256x36xf32>, vector<36x64xf32>, vector<256x64xf32> -> vector<256x64xf32>
    %c0_3 = arith.constant 0 : index
    %c0_4 = arith.constant 0 : index
    %3 = vector.load %arg3[%c0_3, %c0_4] : memref<1x64xf32, #tpu.memory_space<vmem>>, vector<1x64xf32>
    %4 = vector.broadcast %3 : vector<1x64xf32> to vector<256x64xf32>
    %5 = arith.addf %2, %4 : vector<256x64xf32>
    %c0_5 = arith.constant 0 : index
    %c0_6 = arith.constant 0 : index
    %6 = vector.load %arg4[%c0_5, %c0_6] : memref<256x64xf32, #tpu.memory_space<vmem>>, vector<256x64xf32>
    tpu.vector_store %arg4[%c0_5, %c0_6], %5 {strides = array<i32>} : memref<256x64xf32, #tpu.memory_space<vmem>>, vector<256x64xf32>,
    return
  }
  func.func @transform_0(%arg0: i32) -> (i32, i32) {
    %c0_i32 = arith.constant 0 : i32
    %c0_i32_0 = arith.constant 0 : i32
    return %arg0, %c0_i32 : i32, i32
  }
  func.func @transform_1(%arg0: i32) -> (i32, i32) {
    %c0_i32 = arith.constant 0 : i32
    %c0_i32_0 = arith.constant 0 : i32
    %c0_i32_1 = arith.constant 0 : i32
    return %c0_i32, %c0_i32_0 : i32, i32
  }
  func.func @transform_2(%arg0: i32) -> (i32, i32) {
    %c0_i32 = arith.constant 0 : i32
    %c0_i32_0 = arith.constant 0 : i32
    %c0_i32_1 = arith.constant 0 : i32
    return %c0_i32, %c0_i32_0 : i32, i32
  }
  func.func @transform_3(%arg0: i32) -> (i32, i32) {
    %c0_i32 = arith.constant 0 : i32
    %c0_i32_0 = arith.constant 0 : i32
    return %arg0, %c0_i32 : i32, i32
  }
}

</mosaic_0001>

<bundles_post_ra>
// kernel: tpu_custom_call.1
= control target key start
LH: loop header
LB: loop body
LE: loop exit
PB: predicated region body
PF: predicated region fallthrough
CT: control target
= control target key end

     0   :  { %s823_s12 = smov 0   ;;  %s1035_s0 = inlined_call_operand.vmem [shape: f32[512,36], index: 0, kind: input, shape index: {}]   ;;  %s1036_s1 = inlined_call_operand.vmem [shape: f32[36,64], index: 1, kind: input, shape index: {}]   ;;  %s1037_s2 = inlined_call_operand.vmem [shape: f32[1,64], index: 2, kind: input, shape index: {}]   ;;  %s1038_s3 = inlined_call_operand.vmem [shape: f32[512,64], index: 3, kind: output, shape index: {}]  }
   0x1 LB: > { %s633_s13 = sadd.s32 4294967295, %s801_s12   ;;  %p637_p0 = scmp.ge.s32.totalorder %s801_s12, 1  ;;  %s801_s12 = sphi %s823_s12, %s13_s12  }
   0x2   : > { %p138_p1 = scmp.lt.s32.totalorder %s801_s12, 3 }
   0x4   : > { %p139_p2 = pnand %p637_p0, %p138_p1 }
   0x5   : > { %v206_v0 = vld [vmem:[%s1036_s1] sm:$0xff] (!%p139_p2)  ;;  %v207_v1 = vld [vmem:[%s1036_s1 + $0x8] sm:$0xff] (!%p139_p2)  ;;  %v208_v2 = vld [vmem:[%s1036_s1 + $0x10] sm:$0xff] (!%p139_p2)  ;;  %s638_s20 = sshll.u32 (!%p139_p2), %s633_s13, 5  ;;  %vm315_vm0 = vcmask (!%p139_p2), 1043456   ;;  %vm218_vm1 = vcmask (!%p139_p2), 293888  }
   0x6   : > { %142 = sbr.rel (%p139_p2) target bundleno = 263 (0x107), region = 32  ;;  %v773_v3 = vpack.c.bf16 (!%p139_p2), %v207_v1, %v206_v0  ;;  %v209_v4 = vld [vmem:[%s1036_s1 + $0x18] sm:$0xff] (!%p139_p2)  ;;  %p163_p3 = scmp.lt.s32.totalorder (!%p139_p2), %s638_s20, 63  ;;  %v210_v6 = vld [vmem:[%s1036_s1 + $0x20] sm:$0xf] (!%p139_p2)  ;;  %vm544_vm2 = vcmask (!%p139_p2), 523264  }
   0x7   : > { %v777_v5 = vpack.c.bf16 (!%p139_p2), %v209_v4, %v208_v2  ;;  %v927_v39 = vld [vmem:[%s1037_s2] ss:$0 sm:$0xff] (!%p139_p2) }
   0x8   : > { %774 = vmatprep.subr.bf16.mxu0 (!%p139_p2), %v773_v3  ;;  %781 = vmatprep.subr.bf16.mxu1 (!%p139_p2), %v773_v3 }
   0x9   : > { %776 = vmatpush3.bf16.msra.mxu0 (!%p139_p2), %v773_v3  ;;  %784 = vmatpush3.bf16.msra.mxu1 (!%p139_p2), %v773_v3 }
   0xa   : > { %778 = vmatprep.subr.bf16.mxu0 (!%p139_p2), %v777_v5  ;;  %782 = vmatprep.subr.bf16.mxu1 (!%p139_p2), %v777_v5 }
   0xd   : > { %s1040_s20 = smov (!%p163_p3, %s638_s20), 63  ;;  %780 = vmatpush3.bf16.msra.mxu0 %v777_v5  ;;  %785 = vmatpush3.bf16.msra.mxu1 %v777_v5 }
   0xe   : > { %s639_s23 = sshll.u32 %s1040_s20, 3  ;;  %723 = vmatprep.subr.msk.mxu0 %vm315_vm0, %v210_v6  ;;  %783 = vmatprep.subr.msk.mxu1 %vm315_vm0, %v210_v6 }
   0xf   : > { %s854_s28 = scalar_lea.vmem %s1035_s0, %s639_s23  ;;  %s934_s6 = scalar_lea.vmem %s1038_s3, %s639_s23 }
  0x10   : > { %v174_v7 = vld [vmem:[%s854_s28] sm:$0xff]  ;;  %v175_v9 = vld [vmem:[%s854_s28 + $0x8] sm:$0xff]  ;;  %v176_v11 = vld [vmem:[%s854_s28 + $0x10] sm:$0xff] }
  0x11   : > { %v190_v8 = vld [vmem:[%s854_s28 + $0x80] sm:$0xff]  ;;  %725 = vmatprep.mubr.msk.f32.mxu0 %vm218_vm1, %v174_v7  ;;  %v191_v10 = vld [vmem:[%s854_s28 + $0x88] sm:$0xff]  ;;  %v192_v12 = vld [vmem:[%s854_s28 + $0x90] sm:$0xff]  ;;  %724 = vmatpush3.msk.msra.mxu0 %vm315_vm0, %v210_v6 }
  0x12   : > { %749 = vmatprep.mubr.msk.f32.mxu1 %vm218_vm1, %v190_v8  ;;  %786 = vmatpush3.msk.msra.mxu1 %vm315_vm0, %v210_v6  ;;  %v177_v13 = vld [vmem:[%s854_s28 + $0x18] sm:$0xff]  ;;  %v178_v15 = vld [vmem:[%s854_s28 + $0x20] sm:$0xff]  ;;  %v179_v17 = vld [vmem:[%s854_s28 + $0x28] sm:$0xff] }
  0x13   : > { %726 = vmatmul.mubr.msk.f32.vlgmr.msra.gmra.mrb[0].mxu0 %vm218_vm1, %v175_v9  ;;  %750 = vmatmul.mubr.msk.f32.vlgmr.msra.gmra.mrb[0].mxu1 %vm218_vm1, %v191_v10  ;;  %v193_v14 = vld [vmem:[%s854_s28 + $0x98] sm:$0xff]  ;;  %v194_v16 = vld [vmem:[%s854_s28 + $0xa0] sm:$0xff]  ;;  %v195_v18 = vld [vmem:[%s854_s28 + $0xa8] sm:$0xff] }
  0x14   : > { %728 = vmatprep.mubr.msk.f32.mxu0 %vm218_vm1, %v176_v11  ;;  %752 = vmatprep.mubr.msk.f32.mxu1 %vm218_vm1, %v192_v12  ;;  %v180_v19 = vld [vmem:[%s854_s28 + $0x30] sm:$0xff]  ;;  %v181_v21 = vld [vmem:[%s854_s28 + $0x38] sm:$0xff]  ;;  %v182_v23 = vld [vmem:[%s854_s28 + $0x40] sm:$0xff] }
  0x15   : > { %v196_v20 = vld [vmem:[%s854_s28 + $0xb0] sm:$0xff]  ;;  %v197_v22 = vld [vmem:[%s854_s28 + $0xb8] sm:$0xff]  ;;  %v198_v24 = vld [vmem:[%s854_s28 + $0xc0] sm:$0xff] }
  0x16   : > { %v183_v25 = vld [vmem:[%s854_s28 + $0x48] sm:$0xff]  ;;  %v184_v27 = vld [vmem:[%s854_s28 + $0x50] sm:$0xff]  ;;  %v185_v29 = vld [vmem:[%s854_s28 + $0x58] sm:$0xff] }
  0x17   : > { %729 = vmatmul.mubr.msk.f32.gmra.mrb[2].mxu0 %vm218_vm1, %v177_v13  ;;  %753 = vmatmul.mubr.msk.f32.gmra.mrb[2].mxu1 %vm218_vm1, %v193_v14  ;;  %v199_v26 = vld [vmem:[%s854_s28 + $0xc8] sm:$0xff]  ;;  %v200_v28 = vld [vmem:[%s854_s28 + $0xd0] sm:$0xff]  ;;  %v201_v30 = vld [vmem:[%s854_s28 + $0xd8] sm:$0xff] }
  0x18   : > { %731 = vmatprep.mubr.msk.f32.mxu0 %vm218_vm1, %v178_v15  ;;  %755 = vmatprep.mubr.msk.f32.mxu1 %vm218_vm1, %v194_v16  ;;  %v186_v31 = vld [vmem:[%s854_s28 + $0x60] sm:$0xff]  ;;  %v187_v33 = vld [vmem:[%s854_s28 + $0x68] sm:$0xff]  ;;  %v188_v35 = vld [vmem:[%s854_s28 + $0x70] sm:$0xff] }
  0x19   : > { %v202_v32 = vld [vmem:[%s854_s28 + $0xe0] sm:$0xff]  ;;  %v203_v34 = vld [vmem:[%s854_s28 + $0xe8] sm:$0xff]  ;;  %v204_v36 = vld [vmem:[%s854_s28 + $0xf0] sm:$0xff] }
  0x1a   : > { %v189_v37 = vld [vmem:[%s854_s28 + $0x78] sm:$0xff] }
  0x1b   : > { %732 = vmatmul.mubr.msk.f32.gmra.mrb[4].mxu0 %vm218_vm1, %v179_v17  ;;  %756 = vmatmul.mubr.msk.f32.gmra.mrb[4].mxu1 %vm218_vm1, %v195_v18  ;;  %v205_v38 = vld [vmem:[%s854_s28 + $0xf8] sm:$0xff] }
  0x1c   : > { %734 = vmatprep.mubr.msk.f32.mxu0 %vm218_vm1, %v180_v19  ;;  %758 = vmatprep.mubr.msk.f32.mxu1 %vm218_vm1, %v196_v20 }
  0x1f   : > { %735 = vmatmul.mubr.msk.f32.gmra.mrb[6].mxu0 %vm218_vm1, %v181_v21  ;;  %759 = vmatmul.mubr.msk.f32.gmra.mrb[6].mxu1 %vm218_vm1, %v197_v22 }
  0x20   : > { %737 = vmatprep.mubr.msk.f32.mxu0 %vm218_vm1, %v182_v23  ;;  %761 = vmatprep.mubr.msk.f32.mxu1 %vm218_vm1, %v198_v24 }
  0x23   : > { %738 = vmatmul.mubr.msk.f32.gmra.mrb[8].mxu0 %vm218_vm1, %v183_v25  ;;  %762 = vmatmul.mubr.msk.f32.gmra.mrb[8].mxu1 %vm218_vm1, %v199_v26 }
  0x24   : > { %740 = vmatprep.mubr.msk.f32.mxu0 %vm218_vm1, %v184_v27  ;;  %764 = vmatprep.mubr.msk.f32.mxu1 %vm218_vm1, %v200_v28 }
  0x27   : > { %741 = vmatmul.mubr.msk.f32.gmra.mrb[10].mxu0 %vm218_vm1, %v185_v29  ;;  %765 = vmatmul.mubr.msk.f32.gmra.mrb[10].mxu1 %vm218_vm1, %v201_v30 }
  0x28   : > { %743 = vmatprep.mubr.msk.f32.mxu0 %vm218_vm1, %v186_v31  ;;  %767 = vmatprep.mubr.msk.f32.mxu1 %vm218_vm1, %v202_v32 }
  0x2b   : > { %744 = vmatmul.mubr.msk.f32.gmra.mrb[12].mxu0 %vm218_vm1, %v187_v33  ;;  %768 = vmatmul.mubr.msk.f32.gmra.mrb[12].mxu1 %vm218_vm1, %v203_v34 }
  0x2c   : > { %746 = vmatprep.mubr.msk.f32.mxu0 %vm218_vm1, %v188_v35  ;;  %770 = vmatprep.mubr.msk.f32.mxu1 %vm218_vm1, %v204_v36 }
  0x2f   : > { %747 = vmatmul.mubr.msk.f32.gmra.mrb[14].mxu0 %vm218_vm1, %v189_v37  ;;  %771 = vmatmul.mubr.msk.f32.gmra.mrb[14].mxu1 %vm218_vm1, %v205_v38 }
  0xe6   : > { %v727_v40 = vpop.f32.mrb[0].mxu0  ;;  %v751_v41 = vpop.f32.mrb[0].mxu1 }
  0xe7   : > { %v391_v42 = vadd.f32 %v727_v40, %v927_v39  ;;  %v471_v43 = vadd.f32 %v751_v41, %v927_v39  ;;  %v385_v44 = vpop.f32.mrb[1].mxu0  ;;  %v465_v45 = vpop.f32.mrb[1].mxu1 }
  0xe8   : > { %v386_v46 = vadd.f32 %v927_v39, %v385_v44  ;;  %v466_v47 = vadd.f32 %v927_v39, %v465_v45 }
  0xe9   : > { %546 = vst.msk [vmem:[%s934_s6 + $0x8] sm:$0xff] %vm544_vm2, %v391_v42  ;;  %562 = vst.msk [vmem:[%s934_s6 + $0x88] sm:$0xff] %vm544_vm2, %v471_v43 }
  0xea   : > { %545 = vst.msk [vmem:[%s934_s6] sm:$0xff] %vm544_vm2, %v386_v46  ;;  %561 = vst.msk [vmem:[%s934_s6 + $0x80] sm:$0xff] %vm544_vm2, %v466_v47  ;;  %v730_v48 = vpop.f32.mrb[2].mxu0  ;;  %v754_v49 = vpop.f32.mrb[2].mxu1 }
  0xeb   : > { %v401_v50 = vadd.f32 %v730_v48, %v927_v39  ;;  %v481_v51 = vadd.f32 %v754_v49, %v927_v39  ;;  %v395_v52 = vpop.f32.mrb[3].mxu0  ;;  %v475_v53 = vpop.f32.mrb[3].mxu1 }
  0xec   : > { %v396_v54 = vadd.f32 %v927_v39, %v395_v52  ;;  %v476_v55 = vadd.f32 %v927_v39, %v475_v53 }
  0xed   : > { %548 = vst.msk [vmem:[%s934_s6 + $0x18] sm:$0xff] %vm544_vm2, %v401_v50  ;;  %564 = vst.msk [vmem:[%s934_s6 + $0x98] sm:$0xff] %vm544_vm2, %v481_v51 }
  0xee   : > { %547 = vst.msk [vmem:[%s934_s6 + $0x10] sm:$0xff] %vm544_vm2, %v396_v54  ;;  %563 = vst.msk [vmem:[%s934_s6 + $0x90] sm:$0xff] %vm544_vm2, %v476_v55  ;;  %v733_v56 = vpop.f32.mrb[4].mxu0  ;;  %v757_v57 = vpop.f32.mrb[4].mxu1 }
  0xef   : > { %v411_v58 = vadd.f32 %v733_v56, %v927_v39  ;;  %v491_v59 = vadd.f32 %v757_v57, %v927_v39  ;;  %v405_v60 = vpop.f32.mrb[5].mxu0  ;;  %v485_v61 = vpop.f32.mrb[5].mxu1 }
  0xf0   : > { %v406_v62 = vadd.f32 %v927_v39, %v405_v60  ;;  %v486_v63 = vadd.f32 %v927_v39, %v485_v61 }
  0xf1   : > { %550 = vst.msk [vmem:[%s934_s6 + $0x28] sm:$0xff] %vm544_vm2, %v411_v58  ;;  %566 = vst.msk [vmem:[%s934_s6 + $0xa8] sm:$0xff] %vm544_vm2, %v491_v59 }
  0xf2   : > { %549 = vst.msk [vmem:[%s934_s6 + $0x20] sm:$0xff] %vm544_vm2, %v406_v62  ;;  %565 = vst.msk [vmem:[%s934_s6 + $0xa0] sm:$0xff] %vm544_vm2, %v486_v63  ;;  %v736_v0 = vpop.f32.mrb[6].mxu0  ;;  %v760_v1 = vpop.f32.mrb[6].mxu1 }
  0xf3   : > { %v421_v2 = vadd.f32 %v736_v0, %v927_v39  ;;  %v501_v3 = vadd.f32 %v760_v1, %v927_v39  ;;  %v415_v4 = vpop.f32.mrb[7].mxu0  ;;  %v495_v5 = vpop.f32.mrb[7].mxu1 }
  0xf4   : > { %v416_v6 = vadd.f32 %v927_v39, %v415_v4  ;;  %v496_v7 = vadd.f32 %v927_v39, %v495_v5 }
  0xf5   : > { %552 = vst.msk [vmem:[%s934_s6 + $0x38] sm:$0xff] %vm544_vm2, %v421_v2  ;;  %568 = vst.msk [vmem:[%s934_s6 + $0xb8] sm:$0xff] %vm544_vm2, %v501_v3 }
  0xf6   : > { %551 = vst.msk [vmem:[%s934_s6 + $0x30] sm:$0xff] %vm544_vm2, %v416_v6  ;;  %567 = vst.msk [vmem:[%s934_s6 + $0xb0] sm:$0xff] %vm544_vm2, %v496_v7  ;;  %v739_v8 = vpop.f32.mrb[8].mxu0  ;;  %v763_v9 = vpop.f32.mrb[8].mxu1 }
  0xf7   : > { %v431_v10 = vadd.f32 %v739_v8, %v927_v39  ;;  %v511_v11 = vadd.f32 %v763_v9, %v927_v39  ;;  %v425_v12 = vpop.f32.mrb[9].mxu0  ;;  %v505_v13 = vpop.f32.mrb[9].mxu1 }
  0xf8   : > { %v426_v14 = vadd.f32 %v927_v39, %v425_v12  ;;  %v506_v15 = vadd.f32 %v927_v39, %v505_v13 }
  0xf9   : > { %554 = vst.msk [vmem:[%s934_s6 + $0x48] sm:$0xff] %vm544_vm2, %v431_v10  ;;  %570 = vst.msk [vmem:[%s934_s6 + $0xc8] sm:$0xff] %vm544_vm2, %v511_v11 }
  0xfa   : > { %553 = vst.msk [vmem:[%s934_s6 + $0x40] sm:$0xff] %vm544_vm2, %v426_v14  ;;  %569 = vst.msk [vmem:[%s934_s6 + $0xc0] sm:$0xff] %vm544_vm2, %v506_v15  ;;  %v742_v16 = vpop.f32.mrb[10].mxu0  ;;  %v766_v17 = vpop.f32.mrb[10].mxu1 }
  0xfb   : > { %v441_v18 = vadd.f32 %v742_v16, %v927_v39  ;;  %v521_v19 = vadd.f32 %v766_v17, %v927_v39  ;;  %v435_v20 = vpop.f32.mrb[11].mxu0  ;;  %v515_v21 = vpop.f32.mrb[11].mxu1 }
  0xfc   : > { %v436_v22 = vadd.f32 %v927_v39, %v435_v20  ;;  %v516_v23 = vadd.f32 %v927_v39, %v515_v21 }
  0xfd   : > { %556 = vst.msk [vmem:[%s934_s6 + $0x58] sm:$0xff] %vm544_vm2, %v441_v18  ;;  %572 = vst.msk [vmem:[%s934_s6 + $0xd8] sm:$0xff] %vm544_vm2, %v521_v19 }
  0xfe   : > { %555 = vst.msk [vmem:[%s934_s6 + $0x50] sm:$0xff] %vm544_vm2, %v436_v22  ;;  %571 = vst.msk [vmem:[%s934_s6 + $0xd0] sm:$0xff] %vm544_vm2, %v516_v23  ;;  %v745_v24 = vpop.f32.mrb[12].mxu0  ;;  %v769_v25 = vpop.f32.mrb[12].mxu1 }
  0xff   : > { %v451_v26 = vadd.f32 %v745_v24, %v927_v39  ;;  %v531_v27 = vadd.f32 %v769_v25, %v927_v39  ;;  %v445_v28 = vpop.f32.mrb[13].mxu0  ;;  %v525_v29 = vpop.f32.mrb[13].mxu1 }
 0x100   : > { %v446_v30 = vadd.f32 %v927_v39, %v445_v28  ;;  %v526_v31 = vadd.f32 %v927_v39, %v525_v29 }
 0x101   : > { %558 = vst.msk [vmem:[%s934_s6 + $0x68] sm:$0xff] %vm544_vm2, %v451_v26  ;;  %574 = vst.msk [vmem:[%s934_s6 + $0xe8] sm:$0xff] %vm544_vm2, %v531_v27 }
 0x102   : > { %557 = vst.msk [vmem:[%s934_s6 + $0x60] sm:$0xff] %vm544_vm2, %v446_v30  ;;  %573 = vst.msk [vmem:[%s934_s6 + $0xe0] sm:$0xff] %vm544_vm2, %v526_v31  ;;  %v748_v32 = vpop.f32.mrb[14].mxu0  ;;  %v772_v33 = vpop.f32.mrb[14].mxu1 }
 0x103   : > { %v461_v34 = vadd.f32 %v748_v32, %v927_v39  ;;  %v541_v35 = vadd.f32 %v772_v33, %v927_v39  ;;  %v455_v36 = vpop.f32.mrb[15].mxu0  ;;  %v535_v37 = vpop.f32.mrb[15].mxu1 }
 0x104   : > { %v456_v38 = vadd.f32 %v927_v39, %v455_v36  ;;  %v536_v40 = vadd.f32 %v927_v39, %v535_v37 }
 0x105   : > { %560 = vst.msk [vmem:[%s934_s6 + $0x78] sm:$0xff] %vm544_vm2, %v461_v34  ;;  %576 = vst.msk [vmem:[%s934_s6 + $0xf8] sm:$0xff] %vm544_vm2, %v541_v35 }
 0x106   : > { %559 = vst.msk [vmem:[%s934_s6 + $0x70] sm:$0xff] %vm544_vm2, %v456_v38  ;;  %575 = vst.msk [vmem:[%s934_s6 + $0xf0] sm:$0xff] %vm544_vm2, %v536_v40 }
 0x107 PF: > { %s13_s12 = sadd.s32 1, %s801_s12  }
 0x108   : > { %p10_p4 = scmp.ge.s32.totalorder %s13_s12, 4  }
 0x10a   :  { %12 = sbr.rel (!%p10_p4) target bundleno = 1 (0x1), region = 62 }

</bundles_post_ra>
